<compile_context>
chip_gen: v5e
topology: v5e:2x2
jax: 0.10.0
libtpu: 0.0.40
codegen_flags: <defaults>
</compile_context>

<pallas_src>
import functools

import jax
import jax.numpy as jnp
from jax.experimental import pallas as pl
from jax.experimental.pallas import tpu as pltpu


def _layernorm_kernel(x_ref, w_ref, b_ref, o_ref, *, eps, h):
    # x_ref: VMEM (T, H) input rows
    # w_ref: VMEM (1, H) scale   (resident; same block every grid step)
    # b_ref: VMEM (1, H) bias    (resident; same block every grid step)
    # o_ref: VMEM (T, H) output rows
    x = x_ref[...].astype(jnp.float32)                       # (T, H)
    mean = jnp.mean(x, axis=-1, keepdims=True)                # (T, 1)
    xc = x - mean
    # torch.Tensor.std defaults to the unbiased estimator (N-1 denominator).
    var = jnp.sum(xc * xc, axis=-1, keepdims=True) / (h - 1)  # (T, 1)
    std = jnp.sqrt(var)
    y = w_ref[...].astype(jnp.float32) * (xc / (std + eps)) \
        + b_ref[...].astype(jnp.float32)
    o_ref[...] = y.astype(o_ref.dtype)


def layer_norm(x, weight, bias, *, eps=1e-6, block_rows=256):
    """x: (..., H); weight, bias: (H,).  Returns same shape/dtype as x."""
    orig_shape = x.shape
    H = orig_shape[-1]
    x2 = x.reshape(-1, H)
    N = x2.shape[0]

    # T rows per grid step: multiple of 8 (sublane-dense), capped at block_rows.
    T = min(block_rows, ((N + 7) // 8) * 8)
    Np = pl.cdiv(N, T) * T
    if Np != N:
        # Zero-padded rows produce mean=0, std=0 -> 0/(0+eps)=0; no NaNs.
        x2 = jnp.pad(x2, ((0, Np - N), (0, 0)))

    w2 = weight.reshape(1, H)
    b2 = bias.reshape(1, H)

    kernel = functools.partial(_layernorm_kernel, eps=eps, h=float(H))

    out_flat = pl.pallas_call(
        kernel,
        out_shape=jax.ShapeDtypeStruct((Np, H), x.dtype),
        grid_spec=pltpu.PrefetchScalarGridSpec(
            num_scalar_prefetch=0,
            grid=(Np // T,),
            in_specs=[
                pl.BlockSpec((T, H), lambda i: (i, 0)),   # x rows
                pl.BlockSpec((1, H), lambda i: (0, 0)),   # weight (resident)
                pl.BlockSpec((1, H), lambda i: (0, 0)),   # bias   (resident)
            ],
            out_specs=pl.BlockSpec((T, H), lambda i: (i, 0)),
        ),
        compiler_params=pltpu.CompilerParams(
            dimension_semantics=("parallel",),
        ),
    )(x2, w2, b2)

    return out_flat[:N].reshape(orig_shape)


if __name__ == "__main__":
    batch, seq, hidden = 2, 8, 128

    key = jax.random.PRNGKey(0)
    k_x, k_w, k_b = jax.random.split(key, 3)

    # Module init is weights=1, bias=0; use non-trivial (deterministic) values
    # so the affine part of the forward is actually exercised.
    x = jax.random.normal(k_x, (batch, seq, hidden), jnp.float32)
    weight = 1.0 + 0.1 * jax.random.normal(k_w, (hidden,), jnp.float32)
    bias = 0.1 * jax.random.normal(k_b, (hidden,), jnp.float32)

    out = layer_norm(x, weight, bias)
    out = jax.block_until_ready(out)

    # Pure-JAX reference matching torch (unbiased std, eps added to std).
    mean = x.mean(-1, keepdims=True)
    xc = x - mean
    std = jnp.sqrt((xc * xc).sum(-1, keepdims=True) / (hidden - 1))
    expected = weight * xc / (std + 1e-6) + bias

    assert out.shape == (batch, seq, hidden), out.shape
    assert out.dtype == jnp.float32, out.dtype
    assert jnp.allclose(out, expected, atol=1e-5, rtol=1e-5), "mismatch vs reference"

    print("KERNEL_OK")
</pallas_src>

<mosaic_0001>
module attributes {stable_mosaic.version = 11 : i64} {
  func.func @_layernorm_kernel(%arg0: i32, %arg1: memref<16x128xf32, #tpu.memory_space<vmem>>, %arg2: memref<1x128xf32, #tpu.memory_space<vmem>>, %arg3: memref<1x128xf32, #tpu.memory_space<vmem>>, %arg4: memref<16x128xf32, #tpu.memory_space<vmem>>) attributes {dimension_semantics = [#tpu.dimension_semantics<parallel>], iteration_bounds = array<i64: 1>, scalar_prefetch = 0 : i64, scratch_operands = 0 : i64, tpu.core_type = #tpu.core_type<tc>, window_params = [{transform_indices = @transform_0, window_bounds = array<i64: 16, 128>}, {pipeline_mode = #tpu.pipeline_mode<synchronous>, transform_indices = @transform_1, window_bounds = array<i64: 1, 128>}, {pipeline_mode = #tpu.pipeline_mode<synchronous>, transform_indices = @transform_2, window_bounds = array<i64: 1, 128>}, {transform_indices = @transform_3, window_bounds = array<i64: 16, 128>}]} {
    %c0 = arith.constant 0 : index
    %c0_0 = arith.constant 0 : index
    %0 = vector.load %arg1[%c0, %c0_0] : memref<16x128xf32, #tpu.memory_space<vmem>>, vector<16x128xf32>
    %cst = arith.constant dense<0.000000e+00> : vector<16xf32>
    %1 = vector.multi_reduction <add>, %0, %cst [1] : vector<16x128xf32> to vector<16xf32>
    %2 = vector.shape_cast %1 : vector<16xf32> to vector<16x1xf32>
    %cst_1 = arith.constant 1.280000e+02 : f32
    %3 = vector.broadcast %cst_1 : f32 to vector<16x1xf32>
    %4 = arith.divf %2, %3 : vector<16x1xf32>
    %5 = vector.broadcast %4 : vector<16x1xf32> to vector<16x128xf32>
    %6 = arith.subf %0, %5 : vector<16x128xf32>
    %7 = arith.mulf %6, %6 : vector<16x128xf32>
    %cst_2 = arith.constant dense<0.000000e+00> : vector<16xf32>
    %8 = vector.multi_reduction <add>, %7, %cst_2 [1] : vector<16x128xf32> to vector<16xf32>
    %9 = vector.shape_cast %8 : vector<16xf32> to vector<16x1xf32>
    %cst_3 = arith.constant 1.270000e+02 : f32
    %10 = vector.broadcast %cst_3 : f32 to vector<16x1xf32>
    %11 = arith.divf %9, %10 : vector<16x1xf32>
    %12 = math.sqrt %11 : vector<16x1xf32>
    %c0_4 = arith.constant 0 : index
    %c0_5 = arith.constant 0 : index
    %13 = vector.load %arg2[%c0_4, %c0_5] : memref<1x128xf32, #tpu.memory_space<vmem>>, vector<1x128xf32>
    %cst_6 = arith.constant 9.99999997E-7 : f32
    %14 = vector.broadcast %cst_6 : f32 to vector<16x1xf32>
    %15 = arith.addf %12, %14 : vector<16x1xf32>
    %16 = vector.broadcast %15 : vector<16x1xf32> to vector<16x128xf32>
    %17 = arith.divf %6, %16 : vector<16x128xf32>
    %18 = vector.broadcast %13 : vector<1x128xf32> to vector<16x128xf32>
    %19 = arith.mulf %18, %17 : vector<16x128xf32>
    %c0_7 = arith.constant 0 : index
    %c0_8 = arith.constant 0 : index
    %20 = vector.load %arg3[%c0_7, %c0_8] : memref<1x128xf32, #tpu.memory_space<vmem>>, vector<1x128xf32>
    %21 = vector.broadcast %20 : vector<1x128xf32> to vector<16x128xf32>
    %22 = arith.addf %19, %21 : vector<16x128xf32>
    %c0_9 = arith.constant 0 : index
    %c0_10 = arith.constant 0 : index
    %23 = vector.load %arg4[%c0_9, %c0_10] : memref<16x128xf32, #tpu.memory_space<vmem>>, vector<16x128xf32>
    tpu.vector_store %arg4[%c0_9, %c0_10], %22 {strides = array<i32>} : memref<16x128xf32, #tpu.memory_space<vmem>>, vector<16x128xf32>,
    return
  }
  func.func @transform_0(%arg0: i32) -> (i32, i32) {
    %c0_i32 = arith.constant 0 : i32
    %c0_i32_0 = arith.constant 0 : i32
    return %arg0, %c0_i32 : i32, i32
  }
  func.func @transform_1(%arg0: i32) -> (i32, i32) {
    %c0_i32 = arith.constant 0 : i32
    %c0_i32_0 = arith.constant 0 : i32
    %c0_i32_1 = arith.constant 0 : i32
    return %c0_i32, %c0_i32_0 : i32, i32
  }
  func.func @transform_2(%arg0: i32) -> (i32, i32) {
    %c0_i32 = arith.constant 0 : i32
    %c0_i32_0 = arith.constant 0 : i32
    %c0_i32_1 = arith.constant 0 : i32
    return %c0_i32, %c0_i32_0 : i32, i32
  }
  func.func @transform_3(%arg0: i32) -> (i32, i32) {
    %c0_i32 = arith.constant 0 : i32
    %c0_i32_0 = arith.constant 0 : i32
    return %arg0, %c0_i32 : i32, i32
  }
}

</mosaic_0001>

<bundles_post_ra>
// kernel: tpu_custom_call.1
= control target key start
LH: loop header
LB: loop body
LE: loop exit
PB: predicated region body
PF: predicated region fallthrough
CT: control target
= control target key end

     0   :  { %8 = vsyncpa [#allocation3], 0  ;;  %s321_s0 = inlined_call_operand.hbm [shape: f32[16,128], index: 0, kind: input, shape index: {}]   ;;  %s322_s1 = inlined_call_operand.hbm [shape: f32[1,128], index: 1, kind: input, shape index: {}]   ;;  %s323_s2 = inlined_call_operand.vmem [shape: f32[1,128], index: 2, kind: input, shape index: {}]   ;;  %s324_s3 = inlined_call_operand.hbm [shape: f32[16,128], index: 3, kind: output, shape index: {}]  }
   0x1   :  { %9 = vsyncpa [#allocation6], 0 }
   0x2   :  { %10 = vsyncpa [#allocation4], 0  ;;  %s15_s14 = sshll.u32 %s321_s0, 4  ;;  %s266_s15 = smov [#allocation2]   ;;  %s16_s14 = int_to_ptr.hbm [resolvable:$true] %s15_s14 }
   0x3   :  { %s17_s16 = sshll.u32 %s266_s15, 4  ;;  %s29_s19 = sshll.u32 %s322_s1, 4  ;;  %s18_s16 = int_to_ptr.vmem [resolvable:$true] %s17_s16  ;;  %s30_s19 = int_to_ptr.hbm [resolvable:$true] %s29_s19 }
   0x4   :  { %s267_s20 = smov 128   ;;  %s268_s21 = smov 8  }
   0x5   :  { %23 = dma.hbm_to_vmem [thread:$0]  %s16_s14, 256, %s18_s16, [#allocation3], %s267_s20, %s267_s20, %s268_s21  }
   0x6   :  { %s269_s22 = smov [#allocation5]  }
   0x7   :  { %s31_s23 = sshll.u32 %s269_s22, 4  ;;  %s32_s23 = int_to_ptr.vmem [resolvable:$true] %s31_s23 }
   0x8   :  { %34 = dma.hbm_to_vmem [thread:$0]  %s30_s19, 16, %s32_s23, [#allocation6]  }
   0x9   :  { %260 = dma.done.wait [#allocation3], 256  }
   0xa   :  { %261 = vsyncadd [#allocation3], 4294967040 }
   0xb   :  { %262 = dma.done.wait [#allocation6], 16  }
   0xc   :  { %263 = vsyncadd [#allocation6], 4294967280  ;;  %v45_v0 = vld [vmem:[#allocation2] sm:$0xff]  ;;  %v46_v1 = vld [vmem:[#allocation2 + $0x8] sm:$0xff]  ;;  %v270_v2 = vmov 128.0   ;;  %v271_v17 = vmov 127.0  }
   0xd   :  { %47 = vadd.xlane.f32.xlu0 %v45_v0  ;;  %176 = vrcp.f32 %v270_v2  ;;  %v174_v61 = vld [vmem:[#allocation5] ss:$0 sm:$0xff]  ;;  %s272_s24 = smov [#allocation7]   ;;  %s153_s27 = sshll.u32 %s324_s3, 4  ;;  %s154_s27 = int_to_ptr.hbm [resolvable:$true] %s153_s27 }
   0xe   :  { %178 = vrcp.f32 %v271_v17  ;;  %s151_s25 = sshll.u32 %s272_s24, 4  ;;  %s152_s25 = int_to_ptr.vmem [resolvable:$true] %s151_s25 }
  0x13   :  { %v177_v3 = vpop.eup %176 }
  0x14   :  { %v52_v4 = vmul.f32 128.0, %v177_v3  ;;  %vm56_vm0 = vweird.f32 %v177_v3  ;;  %v179_v18 = vpop.eup %178 }
  0x15   :  { %49 = vadd.xlane.f32.xlu0 %v46_v1  ;;  %v69_v19 = vmul.f32 127.0, %v179_v18  ;;  %vm73_vm1 = vweird.f32 %v179_v18 }
  0x16   :  { %v53_v5 = vsub.f32 1.0, %v52_v4 }
  0x17   :  { %v70_v20 = vsub.f32 1.0, %v69_v19 }
  0x18   :  { %v54_v6 = vmul.f32 %v177_v3, %v53_v5 }
  0x19   :  { %v71_v21 = vmul.f32 %v179_v18, %v70_v20 }
  0x1a   :  { %v55_v7 = vadd.f32 %v177_v3, %v54_v6 }
  0x1b   :  { %v72_v22 = vadd.f32 %v179_v18, %v71_v21 }
  0x1c   :  { %v57_v8 = vsel %vm56_vm0, %v177_v3, %v55_v7 }
  0x1d   :  { %v74_v23 = vsel %vm73_vm1, %v179_v18, %v72_v22 }
  0x80   :  { %v48_v9 = vpop.xlane.xlu0 %47 }
  0x81   :  { %v58_v10 = vmul.f32 %v57_v8, %v48_v9 }
  0x83   :  { %v302_v11 = vsub.f32 %v45_v0, %v58_v10 }
  0x85   :  { %v62_v12 = vmul.f32 %v302_v11, %v302_v11 }
  0x87   :  { %64 = vadd.xlane.f32.xlu1 %v62_v12 }
  0x88   :  { %v50_v13 = vpop.xlane.xlu0 %49 }
  0x89   :  { %v59_v14 = vmul.f32 %v57_v8, %v50_v13 }
  0x8b   :  { %v306_v15 = vsub.f32 %v46_v1, %v59_v14  ;;  %v175_v1 = vld [vmem:[%s323_s2] ss:$0 sm:$0xff] }
  0x8d   :  { %v63_v16 = vmul.f32 %v306_v15, %v306_v15 }
  0x8f   :  { %66 = vadd.xlane.f32.xlu1 %v63_v16 }
  0xfa   :  { %v65_v24 = vpop.xlane.xlu1 %64 }
  0xfb   :  { %v75_v25 = vmul.f32 %v74_v23, %v65_v24 }
  0xfd   :  { %180 = vrsqrt.f32 %v75_v25  ;;  %vm84_vm2 = vcmp.eq.f32.partialorder %v75_v25, inf  ;;  %v87_v38 = vand.u32 2147483648, %v75_v25  ;;  %vm86_vm3 = vcmp.eq.f32.partialorder %v75_v25, 0.0 }
 0x102   :  { %v67_v26 = vpop.xlane.xlu1 %66 }
 0x103   :  { %v181_v27 = vpop.eup %180  ;;  %v76_v28 = vmul.f32 %v74_v23, %v67_v26 }
 0x104   :  { %v78_v29 = vmul.f32 %v181_v27, %v75_v25 }
 0x105   :  { %182 = vrsqrt.f32 %v76_v28  ;;  %vm96_vm4 = vcmp.eq.f32.partialorder %v76_v28, inf  ;;  %v99_v46 = vand.u32 2147483648, %v76_v28  ;;  %vm98_vm5 = vcmp.eq.f32.partialorder %v76_v28, 0.0 }
 0x106   :  { %v79_v30 = vmul.f32 %v181_v27, %v78_v29 }
 0x108   :  { %v80_v31 = vmul.f32 0.5, %v79_v30 }
 0x10a   :  { %v81_v32 = vsub.f32 1.5, %v80_v31 }
 0x10b   :  { %v183_v33 = vpop.eup %182 }
 0x10c   :  { %v82_v34 = vmul.f32 %v181_v27, %v81_v32  ;;  %v90_v35 = vmul.f32 %v183_v33, %v76_v28 }
 0x10e   :  { %v83_v36 = vmul.f32 %v82_v34, %v75_v25  ;;  %v91_v37 = vmul.f32 %v183_v33, %v90_v35 }
 0x110   :  { %v85_v39 = vsel %vm84_vm2, %v75_v25, %v83_v36  ;;  %v92_v40 = vmul.f32 0.5, %v91_v37 }
 0x111   :  { %v88_v41 = vsel %vm86_vm3, %v87_v38, %v85_v39 }
 0x112   :  { %v102_v42 = vadd.f32 1e-06, %v88_v41  ;;  %v93_v43 = vsub.f32 1.5, %v92_v40 }
 0x114   :  { %184 = vrcp.f32 %v102_v42  ;;  %v94_v44 = vmul.f32 %v183_v33, %v93_v43  ;;  %v115_v53 = vand.u32 2147483648, %v102_v42  ;;  %v113_v55 = vand.u32 2147483647, %v102_v42 }
 0x115   :  { %vm109_vm7 = vweird.f32 %v102_v42 }
 0x116   :  { %v95_v45 = vmul.f32 %v94_v44, %v76_v28  ;;  %v116_v58 = vor.u32 1.1754944e-38, %v115_v53  ;;  %vm114_vm9 = vcmp.eq.f32.partialorder %v113_v55, 8.507059e+37 }
 0x118   :  { %v97_v47 = vsel %vm96_vm4, %v76_v28, %v95_v45 }
 0x119   :  { %v100_v48 = vsel %vm98_vm5, %v99_v46, %v97_v47 }
 0x11a   :  { %v185_v49 = vpop.eup %184  ;;  %v103_v50 = vadd.f32 1e-06, %v100_v48 }
 0x11b   :  { %v105_v51 = vmul.f32 %v185_v49, %v102_v42  ;;  %vm110_vm6 = vweird.f32 %v185_v49 }
 0x11c   :  { %186 = vrcp.f32 %v103_v50  ;;  %vm111_vm8 = vmor %vm109_vm7, %vm110_vm6  ;;  %v130_v2 = vand.u32 2147483648, %v103_v50  ;;  %v128_v4 = vand.u32 2147483647, %v103_v50  ;;  %vm124_vm11 = vweird.f32 %v103_v50 }
 0x11d   :  { %v106_v52 = vsub.f32 1.0, %v105_v51 }
 0x11e   :  { %v131_v8 = vor.u32 1.1754944e-38, %v130_v2  ;;  %vm129_vm13 = vcmp.eq.f32.partialorder %v128_v4, 8.507059e+37 }
 0x11f   :  { %v107_v54 = vmul.f32 %v185_v49, %v106_v52 }
 0x121   :  { %v108_v56 = vadd.f32 %v185_v49, %v107_v54 }
 0x122   :  { %v187_v57 = vpop.eup %186 }
 0x123   :  { %v112_v59 = vsel %vm111_vm8, %v185_v49, %v108_v56  ;;  %v120_v60 = vmul.f32 %v187_v57, %v103_v50  ;;  %vm125_vm10 = vweird.f32 %v187_v57 }
 0x124   :  { %v117_v62 = vsel %vm114_vm9, %v116_v58, %v112_v59  ;;  %vm126_vm12 = vmor %vm124_vm11, %vm125_vm10 }
 0x125   :  { %v118_v63 = vmul.f32 %v117_v62, %v302_v11  ;;  %v121_v0 = vsub.f32 1.0, %v120_v60 }
 0x127   :  { %v122_v3 = vmul.f32 %v187_v57, %v121_v0  ;;  %v137_v5 = vmul.f32 %v174_v61, %v118_v63 }
 0x129   :  { %v123_v6 = vadd.f32 %v187_v57, %v122_v3  ;;  %v143_v7 = vadd.f32 %v175_v1, %v137_v5 }
 0x12b   :  { %v127_v9 = vsel %vm126_vm12, %v187_v57, %v123_v6  ;;  %145 = vst [vmem:[#allocation7] sm:$0xff] %v143_v7 }
 0x12c   :  { %v132_v10 = vsel %vm129_vm13, %v131_v8, %v127_v9 }
 0x12d   :  { %v133_v11 = vmul.f32 %v132_v10, %v306_v15 }
 0x12f   :  { %v138_v12 = vmul.f32 %v174_v61, %v133_v11 }
 0x131   :  { %v144_v13 = vadd.f32 %v175_v1, %v138_v12 }
 0x133   :  { %146 = vst [vmem:[#allocation7 + $0x8] sm:$0xff] %v144_v13 }
 0x134   :  { %159 = dma.vmem_to_hbm [thread:$0]  %s152_s25, 256, %s154_s27, [#allocation4], %s267_s20, %s267_s20, %s268_s21  }
 0x135   :  { %264 = dma.done.wait [#allocation4], 256  }
 0x136   :  { %265 = vsyncadd [#allocation4], 4294967040 }
 0x137   :  { %164 = vsyncpa [#allocation3], 1 }
 0x138   :  { %165 = vsyncpa [#allocation6], 1 }
 0x139   :  { %166 = vsyncpa [#allocation4], 1 }

</bundles_post_ra>
